<compile_context>
chip_gen: v7x
topology: tpu7x:2x2x1
jax: 0.10.0
libtpu: 0.0.40
codegen_flags: <defaults>
</compile_context>

<pallas_src>
import functools

import jax
import jax.numpy as jnp
from jax.experimental import pallas as pl
from jax.experimental.pallas import tpu as pltpu


_VMEM_CAP_BYTES = 44 << 20   # keep the scoped-VMEM request <= ~44 MiB (v7x: 64 MiB/TC)


def autoencoder_kernel(x_ref, gwT_ref, bg_ref, hwT_ref, bh_ref, out_ref):
    # x_ref   : (TB, N) f32   tile of user vectors
    # gwT_ref : (N, K)  bf16  g.weight^T (pre-transposed in the wrapper)
    # bg_ref  : (1, K)  f32   g.bias
    # hwT_ref : (K, N)  bf16  h.weight^T (pre-transposed in the wrapper)
    # bh_ref  : (1, N)  f32   h.bias
    x = x_ref[...].astype(jnp.bfloat16)     # bf16 MXU operands, f32 accumulation

    z1 = jnp.dot(x, gwT_ref[...], preferred_element_type=jnp.float32) + bg_ref[...]
    h1 = jax.nn.sigmoid(z1)                  # keep non-MXU math in f32

    z2 = jnp.dot(h1.astype(jnp.bfloat16), hwT_ref[...],
                 preferred_element_type=jnp.float32) + bh_ref[...]
    out_ref[...] = jax.nn.sigmoid(z2).astype(out_ref.dtype)


def _round_up(v, m):
    return -(-v // m) * m


def _vmem_request_bytes(tb, n, k):
    f32, bf16 = 4, 2
    footprint = (
        2 * tb * n * f32           # x tile, double-buffered
        + 2 * tb * n * f32         # out tile, double-buffered
        + 2 * 2 * n * k * bf16     # both (transposed) bf16 weights, double-buffered
        + 2 * (k + n) * f32        # biases (tiny)
        + tb * (k + n) * f32       # intermediates (z1/h1, z2)
    )
    return max(4 << 20, 2 * footprint)      # 2x headroom, 4 MiB floor


def _pick_tile(block_b, batch, n, k):
    """Sublane-aligned batch tile that fits the VMEM cap on every TPU gen."""
    b8 = _round_up(batch, 8)
    tb = max(8, min(_round_up(block_b, 8), b8))
    while tb > 8 and _vmem_request_bytes(tb, n, k) > _VMEM_CAP_BYTES:
        tb = max(8, _round_up(tb // 2, 8))
    return tb


@functools.partial(jax.jit, static_argnames=("block_b", "core_parallel"))
def _autoencoder_forward_impl(x, g_weight, g_bias, h_weight, h_bias, *,
                              block_b, core_parallel):
    B, N = x.shape
    K = g_weight.shape[0]

    tb = _pick_tile(block_b, B, N, K)
    b_pad = _round_up(B, tb)                 # pad to a multiple of tb: no partial tail block
    if b_pad != B:
        x = jnp.pad(x, ((0, b_pad - B), (0, 0)))
    grid = (b_pad // tb,)

    # One-time layout/dtype prep (negligible vs. the batch work): pre-transpose
    # so the kernel uses plain row-major dots, and cast weights to bf16 for the
    # bf16-native MXU.
    gwT = g_weight.T.astype(jnp.bfloat16)            # (N, K)
    hwT = h_weight.T.astype(jnp.bfloat16)            # (K, N)
    bg = g_bias.reshape(1, K).astype(jnp.float32)
    bh = h_bias.reshape(1, N).astype(jnp.float32)

    if core_parallel:
        semantics = (getattr(pltpu, "CORE_PARALLEL"),)   # split batch loop across TCs (v7x)
    else:
        semantics = ("parallel",)

    vmem_limit = int(min(_VMEM_CAP_BYTES, _vmem_request_bytes(tb, N, K)))

    out = pl.pallas_call(
        autoencoder_kernel,
        out_shape=jax.ShapeDtypeStruct((b_pad, N), x.dtype),
        grid_spec=pltpu.PrefetchScalarGridSpec(
            num_scalar_prefetch=0,
            grid=grid,
            in_specs=[
                pl.BlockSpec((tb, N), lambda i: (i, 0)),   # x: tiled over batch
                pl.BlockSpec((N, K), lambda i: (0, 0)),    # g.weight^T: VMEM-resident
                pl.BlockSpec((1, K), lambda i: (0, 0)),    # g.bias:     VMEM-resident
                pl.BlockSpec((K, N), lambda i: (0, 0)),    # h.weight^T: VMEM-resident
                pl.BlockSpec((1, N), lambda i: (0, 0)),    # h.bias:     VMEM-resident
            ],
            out_specs=pl.BlockSpec((tb, N), lambda i: (i, 0)),
        ),
        compiler_params=pltpu.CompilerParams(
            dimension_semantics=semantics,
            vmem_limit_bytes=vmem_limit,
        ),
    )(x, gwT, bg, hwT, bh)

    return out[:B] if b_pad != B else out


_core_parallel_ok = None   # tri-state cache: None = untried, True/False = decided


def autoencoder_forward(x, g_weight, g_bias, h_weight, h_bias, *, block_b=1024):
    """sigmoid(h(sigmoid(g(x)))) — matches AutoEncoder.forward.

    x        : (B, N) f32
    g_weight : (K, N) f32  (PyTorch Linear layout: out_features x in_features)
    g_bias   : (K,)   f32
    h_weight : (N, K) f32
    h_bias   : (N,)   f32
    """
    global _core_parallel_ok
    if _core_parallel_ok is None:
        _core_parallel_ok = hasattr(pltpu, "CORE_PARALLEL")
    if _core_parallel_ok:
        try:
            out = _autoencoder_forward_impl(
                x, g_weight, g_bias, h_weight, h_bias,
                block_b=block_b, core_parallel=True)
            return jax.block_until_ready(out)
        except Exception:
            # CORE_PARALLEL semantics not supported on this chip / jax build:
            # fall back to plain "parallel" (identical codegen on 1-TC chips).
            _core_parallel_ok = False
    out = _autoencoder_forward_impl(
        x, g_weight, g_bias, h_weight, h_bias,
        block_b=block_b, core_parallel=False)
    return jax.block_until_ready(out)


def reference_forward(x, g_weight, g_bias, h_weight, h_bias, cast=jnp.float32):
    h1 = jax.nn.sigmoid(
        jnp.dot(x.astype(cast), g_weight.T.astype(cast),
                preferred_element_type=jnp.float32) + g_bias)
    return jax.nn.sigmoid(
        jnp.dot(h1.astype(cast), h_weight.T.astype(cast),
                preferred_element_type=jnp.float32) + h_bias)


if __name__ == "__main__":
    # Small shapes consistent with the module: NUM_QUESTION questions per user
    # vector, hidden size K, a batch of user vectors.
    NUM_QUESTION = 256
    K = 128

    key = jax.random.PRNGKey(0)
    kx1, kx2, kgw, kgb, khw, khb = jax.random.split(key, 6)

    # Deterministic synthetic parameters (PyTorch Linear shapes: (out, in)).
    g_weight = jax.random.normal(kgw, (K, NUM_QUESTION), dtype=jnp.float32) * 0.05
    g_bias = jax.random.normal(kgb, (K,), dtype=jnp.float32) * 0.05
    h_weight = jax.random.normal(khw, (NUM_QUESTION, K), dtype=jnp.float32) * 0.05
    h_bias = jax.random.normal(khb, (NUM_QUESTION,), dtype=jnp.float32) * 0.05

    # Case 1: batch larger than the tile -> exercises the batch grid
    # (block_b=16 here just to force multiple grid steps at small scale).
    B1 = 64
    x1 = jax.random.normal(kx1, (B1, NUM_QUESTION), dtype=jnp.float32)
    out1 = autoencoder_forward(x1, g_weight, g_bias, h_weight, h_bias, block_b=16)
    out1 = jax.block_until_ready(out1)
    ref1_bf16 = reference_forward(x1, g_weight, g_bias, h_weight, h_bias, cast=jnp.bfloat16)
    ref1_f32 = reference_forward(x1, g_weight, g_bias, h_weight, h_bias, cast=jnp.float32)
    assert out1.shape == (B1, NUM_QUESTION)
    assert jnp.allclose(out1, ref1_bf16, atol=2e-3, rtol=2e-3), "mismatch vs bf16 reference (tiled)"
    assert jnp.allclose(out1, ref1_f32, atol=3e-2, rtol=3e-2), "mismatch vs f32 reference (tiled)"

    # Case 2: batch not a multiple of 8 and default (large) tile -> exercises
    # the pad/slice path and tile clamping.
    B2 = 5
    x2 = jax.random.normal(kx2, (B2, NUM_QUESTION), dtype=jnp.float32)
    out2 = autoencoder_forward(x2, g_weight, g_bias, h_weight, h_bias)
    out2 = jax.block_until_ready(out2)
    ref2_bf16 = reference_forward(x2, g_weight, g_bias, h_weight, h_bias, cast=jnp.bfloat16)
    ref2_f32 = reference_forward(x2, g_weight, g_bias, h_weight, h_bias, cast=jnp.float32)
    assert out2.shape == (B2, NUM_QUESTION)
    assert jnp.allclose(out2, ref2_bf16, atol=2e-3, rtol=2e-3), "mismatch vs bf16 reference (padded)"
    assert jnp.allclose(out2, ref2_f32, atol=3e-2, rtol=3e-2), "mismatch vs f32 reference (padded)"

    # TODO(synk): get_weight_norm() and the training loop are plain host-side
    # math (a couple of norms / optimizer steps); no kernel needed.
    print("KERNEL_OK")
</pallas_src>

<mosaic_0001>
module attributes {stable_mosaic.version = 11 : i64} {
  func.func @autoencoder_kernel(%arg0: i32, %arg1: memref<16x256xf32, #tpu.memory_space<vmem>>, %arg2: memref<256x128xbf16, #tpu.memory_space<vmem>>, %arg3: memref<1x128xf32, #tpu.memory_space<vmem>>, %arg4: memref<128x256xbf16, #tpu.memory_space<vmem>>, %arg5: memref<1x256xf32, #tpu.memory_space<vmem>>, %arg6: memref<16x256xf32, #tpu.memory_space<vmem>>) attributes {dimension_semantics = [#tpu.dimension_semantics<core_parallel>], iteration_bounds = array<i64: 4>, scalar_prefetch = 0 : i64, scratch_operands = 0 : i64, tpu.core_type = #tpu.core_type<tc>, window_params = [{transform_indices = @transform_0, window_bounds = array<i64: 16, 256>}, {pipeline_mode = #tpu.pipeline_mode<synchronous>, transform_indices = @transform_1, window_bounds = array<i64: 256, 128>}, {pipeline_mode = #tpu.pipeline_mode<synchronous>, transform_indices = @transform_2, window_bounds = array<i64: 1, 128>}, {pipeline_mode = #tpu.pipeline_mode<synchronous>, transform_indices = @transform_3, window_bounds = array<i64: 128, 256>}, {pipeline_mode = #tpu.pipeline_mode<synchronous>, transform_indices = @transform_4, window_bounds = array<i64: 1, 256>}, {transform_indices = @transform_5, window_bounds = array<i64: 16, 256>}]} {
    %c0 = arith.constant 0 : index
    %c0_0 = arith.constant 0 : index
    %0 = vector.load %arg1[%c0, %c0_0] : memref<16x256xf32, #tpu.memory_space<vmem>>, vector<16x256xf32>
    %1 = arith.truncf %0 : vector<16x256xf32> to vector<16x256xbf16>
    %c0_1 = arith.constant 0 : index
    %c0_2 = arith.constant 0 : index
    %2 = vector.load %arg2[%c0_1, %c0_2] : memref<256x128xbf16, #tpu.memory_space<vmem>>, vector<256x128xbf16>
    %cst = arith.constant dense<0.000000e+00> : vector<16x128xf32>
    %3 = tpu.matmul %1, %2, %cst {dimension_numbers = #tpu.dot_dimension_numbers<[1], [0], [0], [1], [0, 0, 1, 1], [], []>} : vector<16x256xbf16>, vector<256x128xbf16>, vector<16x128xf32> -> vector<16x128xf32>
    %c0_3 = arith.constant 0 : index
    %c0_4 = arith.constant 0 : index
    %4 = vector.load %arg3[%c0_3, %c0_4] : memref<1x128xf32, #tpu.memory_space<vmem>>, vector<1x128xf32>
    %5 = vector.broadcast %4 : vector<1x128xf32> to vector<16x128xf32>
    %6 = arith.addf %3, %5 : vector<16x128xf32>
    %7 = arith.negf %6 : vector<16x128xf32>
    %8 = math.exp %7 : vector<16x128xf32>
    %cst_5 = arith.constant 1.000000e+00 : f32
    %9 = vector.broadcast %cst_5 : f32 to vector<16x128xf32>
    %10 = arith.addf %9, %8 : vector<16x128xf32>
    %11 = arith.divf %9, %10 : vector<16x128xf32>
    %12 = arith.truncf %11 : vector<16x128xf32> to vector<16x128xbf16>
    %c0_6 = arith.constant 0 : index
    %c0_7 = arith.constant 0 : index
    %13 = vector.load %arg4[%c0_6, %c0_7] : memref<128x256xbf16, #tpu.memory_space<vmem>>, vector<128x256xbf16>
    %cst_8 = arith.constant dense<0.000000e+00> : vector<16x256xf32>
    %14 = tpu.matmul %12, %13, %cst_8 {dimension_numbers = #tpu.dot_dimension_numbers<[1], [0], [0], [1], [0, 0, 1, 1], [], []>} : vector<16x128xbf16>, vector<128x256xbf16>, vector<16x256xf32> -> vector<16x256xf32>
    %c0_9 = arith.constant 0 : index
    %c0_10 = arith.constant 0 : index
    %15 = vector.load %arg5[%c0_9, %c0_10] : memref<1x256xf32, #tpu.memory_space<vmem>>, vector<1x256xf32>
    %16 = vector.broadcast %15 : vector<1x256xf32> to vector<16x256xf32>
    %17 = arith.addf %14, %16 : vector<16x256xf32>
    %18 = arith.negf %17 : vector<16x256xf32>
    %19 = math.exp %18 : vector<16x256xf32>
    %cst_11 = arith.constant 1.000000e+00 : f32
    %20 = vector.broadcast %cst_11 : f32 to vector<16x256xf32>
    %21 = arith.addf %20, %19 : vector<16x256xf32>
    %22 = arith.divf %20, %21 : vector<16x256xf32>
    %c0_12 = arith.constant 0 : index
    %c0_13 = arith.constant 0 : index
    %23 = vector.load %arg6[%c0_12, %c0_13] : memref<16x256xf32, #tpu.memory_space<vmem>>, vector<16x256xf32>
    tpu.vector_store %arg6[%c0_12, %c0_13], %22 {strides = array<i32>} : memref<16x256xf32, #tpu.memory_space<vmem>>, vector<16x256xf32>,
    return
  }
  func.func @transform_0(%arg0: i32) -> (i32, i32) {
    %c0_i32 = arith.constant 0 : i32
    %c0_i32_0 = arith.constant 0 : i32
    return %arg0, %c0_i32 : i32, i32
  }
  func.func @transform_1(%arg0: i32) -> (i32, i32) {
    %c0_i32 = arith.constant 0 : i32
    %c0_i32_0 = arith.constant 0 : i32
    %c0_i32_1 = arith.constant 0 : i32
    return %c0_i32, %c0_i32_0 : i32, i32
  }
  func.func @transform_2(%arg0: i32) -> (i32, i32) {
    %c0_i32 = arith.constant 0 : i32
    %c0_i32_0 = arith.constant 0 : i32
    %c0_i32_1 = arith.constant 0 : i32
    return %c0_i32, %c0_i32_0 : i32, i32
  }
  func.func @transform_3(%arg0: i32) -> (i32, i32) {
    %c0_i32 = arith.constant 0 : i32
    %c0_i32_0 = arith.constant 0 : i32
    %c0_i32_1 = arith.constant 0 : i32
    return %c0_i32, %c0_i32_0 : i32, i32
  }
  func.func @transform_4(%arg0: i32) -> (i32, i32) {
    %c0_i32 = arith.constant 0 : i32
    %c0_i32_0 = arith.constant 0 : i32
    %c0_i32_1 = arith.constant 0 : i32
    return %c0_i32, %c0_i32_0 : i32, i32
  }
  func.func @transform_5(%arg0: i32) -> (i32, i32) {
    %c0_i32 = arith.constant 0 : i32
    %c0_i32_0 = arith.constant 0 : i32
    return %arg0, %c0_i32 : i32, i32
  }
}

module attributes {stable_mosaic.version = 11 : i64} {
  func.func @autoencoder_kernel(%arg0: i32, %arg1: memref<16x256xf32, #tpu.memory_space<vmem>>, %arg2: memref<256x128xbf16, #tpu.memory_space<vmem>>, %arg3: memref<1x128xf32, #tpu.memory_space<vmem>>, %arg4: memref<128x256xbf16, #tpu.memory_space<vmem>>, %arg5: memref<1x256xf32, #tpu.memory_space<vmem>>, %arg6: memref<16x256xf32, #tpu.memory_space<vmem>>) attributes {dimension_semantics = [#tpu.dimension_semantics<parallel>], iteration_bounds = array<i64: 4>, scalar_prefetch = 0 : i64, scratch_operands = 0 : i64, tpu.core_type = #tpu.core_type<tc>, window_params = [{transform_indices = @transform_0, window_bounds = array<i64: 16, 256>}, {pipeline_mode = #tpu.pipeline_mode<synchronous>, transform_indices = @transform_1, window_bounds = array<i64: 256, 128>}, {pipeline_mode = #tpu.pipeline_mode<synchronous>, transform_indices = @transform_2, window_bounds = array<i64: 1, 128>}, {pipeline_mode = #tpu.pipeline_mode<synchronous>, transform_indices = @transform_3, window_bounds = array<i64: 128, 256>}, {pipeline_mode = #tpu.pipeline_mode<synchronous>, transform_indices = @transform_4, window_bounds = array<i64: 1, 256>}, {transform_indices = @transform_5, window_bounds = array<i64: 16, 256>}]} {
    %c0 = arith.constant 0 : index
    %c0_0 = arith.constant 0 : index
    %0 = vector.load %arg1[%c0, %c0_0] : memref<16x256xf32, #tpu.memory_space<vmem>>, vector<16x256xf32>
    %1 = arith.truncf %0 : vector<16x256xf32> to vector<16x256xbf16>
    %c0_1 = arith.constant 0 : index
    %c0_2 = arith.constant 0 : index
    %2 = vector.load %arg2[%c0_1, %c0_2] : memref<256x128xbf16, #tpu.memory_space<vmem>>, vector<256x128xbf16>
    %cst = arith.constant dense<0.000000e+00> : vector<16x128xf32>
    %3 = tpu.matmul %1, %2, %cst {dimension_numbers = #tpu.dot_dimension_numbers<[1], [0], [0], [1], [0, 0, 1, 1], [], []>} : vector<16x256xbf16>, vector<256x128xbf16>, vector<16x128xf32> -> vector<16x128xf32>
    %c0_3 = arith.constant 0 : index
    %c0_4 = arith.constant 0 : index
    %4 = vector.load %arg3[%c0_3, %c0_4] : memref<1x128xf32, #tpu.memory_space<vmem>>, vector<1x128xf32>
    %5 = vector.broadcast %4 : vector<1x128xf32> to vector<16x128xf32>
    %6 = arith.addf %3, %5 : vector<16x128xf32>
    %7 = arith.negf %6 : vector<16x128xf32>
    %8 = math.exp %7 : vector<16x128xf32>
    %cst_5 = arith.constant 1.000000e+00 : f32
    %9 = vector.broadcast %cst_5 : f32 to vector<16x128xf32>
    %10 = arith.addf %9, %8 : vector<16x128xf32>
    %11 = arith.divf %9, %10 : vector<16x128xf32>
    %12 = arith.truncf %11 : vector<16x128xf32> to vector<16x128xbf16>
    %c0_6 = arith.constant 0 : index
    %c0_7 = arith.constant 0 : index
    %13 = vector.load %arg4[%c0_6, %c0_7] : memref<128x256xbf16, #tpu.memory_space<vmem>>, vector<128x256xbf16>
    %cst_8 = arith.constant dense<0.000000e+00> : vector<16x256xf32>
    %14 = tpu.matmul %12, %13, %cst_8 {dimension_numbers = #tpu.dot_dimension_numbers<[1], [0], [0], [1], [0, 0, 1, 1], [], []>} : vector<16x128xbf16>, vector<128x256xbf16>, vector<16x256xf32> -> vector<16x256xf32>
    %c0_9 = arith.constant 0 : index
    %c0_10 = arith.constant 0 : index
    %15 = vector.load %arg5[%c0_9, %c0_10] : memref<1x256xf32, #tpu.memory_space<vmem>>, vector<1x256xf32>
    %16 = vector.broadcast %15 : vector<1x256xf32> to vector<16x256xf32>
    %17 = arith.addf %14, %16 : vector<16x256xf32>
    %18 = arith.negf %17 : vector<16x256xf32>
    %19 = math.exp %18 : vector<16x256xf32>
    %cst_11 = arith.constant 1.000000e+00 : f32
    %20 = vector.broadcast %cst_11 : f32 to vector<16x256xf32>
    %21 = arith.addf %20, %19 : vector<16x256xf32>
    %22 = arith.divf %20, %21 : vector<16x256xf32>
    %c0_12 = arith.constant 0 : index
    %c0_13 = arith.constant 0 : index
    %23 = vector.load %arg6[%c0_12, %c0_13] : memref<16x256xf32, #tpu.memory_space<vmem>>, vector<16x256xf32>
    tpu.vector_store %arg6[%c0_12, %c0_13], %22 {strides = array<i32>} : memref<16x256xf32, #tpu.memory_space<vmem>>, vector<16x256xf32>,
    return
  }
  func.func @transform_0(%arg0: i32) -> (i32, i32) {
    %c0_i32 = arith.constant 0 : i32
    %c0_i32_0 = arith.constant 0 : i32
    return %arg0, %c0_i32 : i32, i32
  }
  func.func @transform_1(%arg0: i32) -> (i32, i32) {
    %c0_i32 = arith.constant 0 : i32
    %c0_i32_0 = arith.constant 0 : i32
    %c0_i32_1 = arith.constant 0 : i32
    return %c0_i32, %c0_i32_0 : i32, i32
  }
  func.func @transform_2(%arg0: i32) -> (i32, i32) {
    %c0_i32 = arith.constant 0 : i32
    %c0_i32_0 = arith.constant 0 : i32
    %c0_i32_1 = arith.constant 0 : i32
    return %c0_i32, %c0_i32_0 : i32, i32
  }
  func.func @transform_3(%arg0: i32) -> (i32, i32) {
    %c0_i32 = arith.constant 0 : i32
    %c0_i32_0 = arith.constant 0 : i32
    %c0_i32_1 = arith.constant 0 : i32
    return %c0_i32, %c0_i32_0 : i32, i32
  }
  func.func @transform_4(%arg0: i32) -> (i32, i32) {
    %c0_i32 = arith.constant 0 : i32
    %c0_i32_0 = arith.constant 0 : i32
    %c0_i32_1 = arith.constant 0 : i32
    return %c0_i32, %c0_i32_0 : i32, i32
  }
  func.func @transform_5(%arg0: i32) -> (i32, i32) {
    %c0_i32 = arith.constant 0 : i32
    %c0_i32_0 = arith.constant 0 : i32
    return %arg0, %c0_i32 : i32, i32
  }
}

</mosaic_0001>

<bundles_post_ra>
// kernel: _autoencoder_forward_impl.1
= control target key start
LH: loop header
LB: loop body
LE: loop exit
PB: predicated region body
PF: predicated region fallthrough
CT: control target
= control target key end

     0   :  { %10 = vsyncpa [#allocation3], 0  ;;  %s1167_s0 = inlined_call_operand.vmem [shape: f32[64,256], index: 0, kind: input, shape index: {}]   ;;  %s1168_s1 = inlined_call_operand.vmem [shape: bf16[256,128], index: 1, kind: input, shape index: {}]   ;;  %s1169_s2 = inlined_call_operand.vmem [shape: f32[1,128], index: 2, kind: input, shape index: {}]   ;;  %s1170_s3 = inlined_call_operand.vmem [shape: bf16[128,256], index: 3, kind: input, shape index: {}]   ;;  %s1171_s4 = inlined_call_operand.vmem [shape: f32[1,256], index: 4, kind: input, shape index: {}]   ;;  %s1172_s5 = inlined_call_operand.hbm [shape: f32[64,256], index: 5, kind: output, shape index: {}]  }
   0x1   :  { %12 = vsyncpa [#allocation3 + $0x1], 0  ;;  %s963_s18 = smov 0   ;;  %s965_s19 = smov 0  }
   0x2   :  { %s967_s20 = smov 0   ;;  %s969_s21 = smov 0  }
   0x3 LB: > { %s984_s22 = sadd.s32 4294967295, %s927_s21   ;;  %s681_s23 = sadd.s32 4294967294, %s927_s21   ;;  %s927_s21 = sphi %s969_s21, %s1178_s21   ;;  %s923_s20 = sphi %s967_s20, %s1177_s20   ;;  %s919_s19 = sphi %s965_s19, %s1176_s19   ;;  %s915_s18 = sphi %s963_s18, %s1175_s18  }
   0x4   : > { %s988_s24 = sadd.s32 1, %s927_s21   ;;  %s135_s25 = sadd.s32 1, %s923_s20 }
   0x5   : > { %s132_s26 = ssub.s32 %s927_s21, %s988_s24  ;;  %p145_p0 = scmp.ne.s32.totalorder %s923_s20, %s919_s19 }
   0x6   : > { %p133_p1 = scmp.eq.s32.totalorder %s132_s26, 0  ;;  %p146_p2 = scmp.eq.s32.totalorder %s984_s22, 3 }
   0x7   : > { %p151_p3 = scmp.ne.s32.totalorder %s919_s19, %s915_s18  ;;  %p152_p4 = scmp.eq.s32.totalorder %s681_s23, 3 }
   0x8   : > { %s999_s27 = scalar_select %p133_p1, %s923_s20, %s135_s25  }
   0x9   : > { %p1001_p5 = por %p146_p2, %p145_p0  ;;  %p1005_p6 = por %p152_p4, %p151_p3 }
   0xa   : > { %p684_p7 = scmp.ge.s32.totalorder %s927_s21, 1  ;;  %p192_p8 = scmp.lt.s32.totalorder %s927_s21, 5 }
   0xc   : > { %p193_p9 = pnand %p684_p7, %p192_p8 }
   0xd   : > { %v801_v0 = vld [vmem:[%s1168_s1 + $0x40] sm:$0xff] (!%p193_p9)   ;;  %s686_s7 = sshll.u32 (!%p193_p9), %s984_s22, 1  ;;  %v803_v2 = vld [vmem:[%s1168_s1 + $0x48] sm:$0xff] (!%p193_p9)   ;;  %v805_v4 = vld [vmem:[%s1168_s1 + $0x50] sm:$0xff] (!%p193_p9)   ;;  %v929_v36 = vmov (!%p193_p9), 0   ;;  %v443_v57 = vlaneseq (!%p193_p9)  ;;  %s218_s15 = sand.u32 (!%p193_p9), 1, %s919_s19  }
   0xe   : > { %196 = sbr.rel (%p193_p9) target bundleno = 551 (0x227), region = 40  ;;  %v802_v1 = vld [vmem:[%s1168_s1] sm:$0xff] (!%p193_p9)   ;;  %737 = vmatprep.subr.bf16.mxu0 (!%p193_p9), %v801_v0  ;;  %p222_p10 = scmp.lt.s32.totalorder (!%p193_p9), %s686_s7, 7  ;;  %v804_v3 = vld [vmem:[%s1168_s1 + $0x8] sm:$0xff] (!%p193_p9)   ;;  %v806_v5 = vld [vmem:[%s1168_s1 + $0x10] sm:$0xff] (!%p193_p9)   ;;  %565 = vmatprep.mubr.bf16.mxu1 (!%p193_p9), %v929_v36 }
   0xf   : > { %738 = vmatpush3.bf16.msra.mxu0 (!%p193_p9), %v802_v1  ;;  %v807_v6 = vld [vmem:[%s1168_s1 + $0x58] sm:$0xff] (!%p193_p9)   ;;  %v809_v8 = vld [vmem:[%s1168_s1 + $0x60] sm:$0xff] (!%p193_p9)   ;;  %v811_v10 = vld [vmem:[%s1168_s1 + $0x68] sm:$0xff] (!%p193_p9)   ;;  %v444_v58 = vshrl.u32 (!%p193_p9), %v443_v57, 7  ;;  %s685_s16 = sshll.u32 (!%p193_p9), %s218_s15, 5  ;;  %s736_s17 = sshll.u32 (!%p193_p9), %s984_s22, 9 }
  0x10   : > { %739 = vmatprep.subr.bf16.mxu0 (!%p193_p9), %v803_v2  ;;  %v808_v7 = vld [vmem:[%s1168_s1 + $0x18] sm:$0xff] (!%p193_p9)   ;;  %v810_v9 = vld [vmem:[%s1168_s1 + $0x20] sm:$0xff] (!%p193_p9)   ;;  %v812_v13 = vld [vmem:[%s1168_s1 + $0x28] sm:$0xff] (!%p193_p9)   ;;  %s1122_s30 = scalar_lea.hbm (!%p193_p9), %s1172_s5, %s736_s17  ;;  %s1126_s22 = scalar_lea.sflag (!%p193_p9), [#allocation3], %s218_s15 }
  0x11   : > { %v813_v15 = vld [vmem:[%s1168_s1 + $0x70] sm:$0xff] (!%p193_p9)   ;;  %v815_v17 = vld [vmem:[%s1168_s1 + $0x78] sm:$0xff] (!%p193_p9)   ;;  %v817_v22 = vld [vmem:[%s1170_s3 + $0x4] ss:$8 sps:$4 sm:$0xff] (!%p193_p9)   ;;  %v445_v59 = vsub.s32 (!%p193_p9), 0, %v444_v58  ;;  %v449_v61 = vsub.s32 (!%p193_p9), 1, %v444_v58 }
  0x12   : > { %v814_v16 = vld [vmem:[%s1168_s1 + $0x30] sm:$0xff] (!%p193_p9)   ;;  %v816_v18 = vld [vmem:[%s1168_s1 + $0x38] sm:$0xff] (!%p193_p9)   ;;  %v819_v23 = vld [vmem:[%s1170_s3] ss:$8 sps:$4 sm:$0xff] (!%p193_p9)   ;;  %533 = vmatprep.subr.bf16.mxu1 (!%p193_p9), %v817_v22  ;;  %s930_s8 = smov (!%p193_p9), [#allocation2]  }
  0x13   : > { %740 = vmatpush3.bf16.msra.mxu0 (!%p193_p9), %v804_v3  ;;  %534 = vmatpush1.bf16.msra.mxu1 (!%p193_p9), %v819_v23  ;;  %v820_v24 = vld [vmem:[%s1170_s3 + $0x14] ss:$8 sps:$4 sm:$0xff] (!%p193_p9)   ;;  %v822_v25 = vld [vmem:[%s1170_s3 + $0x10] ss:$8 sps:$4 sm:$0xff] (!%p193_p9)   ;;  %v823_v26 = vld [vmem:[%s1170_s3 + $0x24] ss:$8 sps:$4 sm:$0xff] (!%p193_p9)  }
  0x14   : > { %741 = vmatprep.subr.bf16.mxu0 (!%p193_p9), %v805_v4  ;;  %535 = vmatprep.subr.bf16.mxu1 (!%p193_p9), %v820_v24  ;;  %v825_v27 = vld [vmem:[%s1170_s3 + $0x20] ss:$8 sps:$4 sm:$0xff] (!%p193_p9)   ;;  %v826_v28 = vld [vmem:[%s1170_s3 + $0x34] ss:$8 sps:$4 sm:$0xff] (!%p193_p9)   ;;  %v828_v29 = vld [vmem:[%s1170_s3 + $0x30] ss:$8 sps:$4 sm:$0xff] (!%p193_p9)  }
  0x15   : > { %s1180_s7 = smov (!%p222_p10, %s686_s7), 7  ;;  %v829_v30 = vld [vmem:[%s1170_s3 + $0x44] ss:$8 sps:$4 sm:$0xff]   ;;  %v831_v31 = vld [vmem:[%s1170_s3 + $0x40] ss:$8 sps:$4 sm:$0xff]   ;;  %s869_s9 = sshll.u32 %s930_s8, 4  ;;  %s870_s9 = int_to_ptr.vmem [resolvable:$false] %s869_s9 }
  0x16   : > { %s734_s26 = sshll.u32 %s1180_s7, 4  ;;  %v832_v32 = vld [vmem:[%s1170_s3 + $0x54] ss:$8 sps:$4 sm:$0xff]   ;;  %v834_v33 = vld [vmem:[%s1170_s3 + $0x50] ss:$8 sps:$4 sm:$0xff]   ;;  %s871_s10 = scalar_lea.vmem %s870_s9, 1024 }
  0x17   : > { %742 = vmatpush3.bf16.msra.mxu0 %v806_v5  ;;  %s226_s12 = scalar_lea.vmem %s1167_s0, %s734_s26  ;;  %536 = vmatpush1.bf16.msra.mxu1 %v822_v25  ;;  %v835_v34 = vld [vmem:[%s1170_s3 + $0x64] ss:$8 sps:$4 sm:$0xff]   ;;  %v837_v35 = vld [vmem:[%s1170_s3 + $0x60] ss:$8 sps:$4 sm:$0xff]   ;;  %v838_v37 = vld [vmem:[%s1170_s3 + $0x74] ss:$8 sps:$4 sm:$0xff]  }
  0x18   : > { %743 = vmatprep.subr.bf16.mxu0 %v807_v6  ;;  %v231_v11 = vld [vmem:[%s226_s12 + $0x8] sm:$0xff]  ;;  %v233_v12 = vld [vmem:[%s226_s12 + $0x18] sm:$0xff]  ;;  %v230_v19 = vld [vmem:[%s226_s12] sm:$0xff]  ;;  %537 = vmatprep.subr.bf16.mxu1 %v823_v26 }
  0x19   : > { %v235_v14 = vpack.c.bf16 %v233_v12, %v231_v11  ;;  %v232_v20 = vld [vmem:[%s226_s12 + $0x10] sm:$0xff]  ;;  %v689_v40 = vld [vmem:[%s1169_s2] ss:$0 sm:$0xff]  ;;  %s220_s12 = scalar_lea.vmem [#allocation2], %s685_s16 }
  0x1a   : > { %v234_v21 = vpack.c.bf16 %v232_v20, %v230_v19  ;;  %v840_v38 = vld [vmem:[%s1170_s3 + $0x70] ss:$8 sps:$4 sm:$0xff]   ;;  %v441_v60 = vld [vmem:[%s1171_s4] sm:$0x3]  ;;  %s619_s23 = sshll.u32 %s220_s12, 4  ;;  %s1124_s23 = int_to_ptr.vmem [resolvable:$true] %s619_s23 }
  0x1b   : > { %744 = vmatpush3.bf16.msra.mxu0 %v808_v7  ;;  %403 = vmatprep.mubr.bf16.mxu0 %v235_v14  ;;  %v446_v62 = vrot.slane %v441_v60, %v445_v59  ;;  %v450_v63 = vrot.slane %v441_v60, %v449_v61  ;;  %s865_s6 = scalar_lea.vmem %s1124_s23, 512  ;;  %p872_p0 = scmp.lt.s32.totalorder %s1124_s23, %s870_s9 }
  0x1c   : > { %745 = vmatprep.subr.bf16.mxu0 %v809_v8  ;;  %538 = vmatpush1.bf16.msra.mxu1 %v825_v27  ;;  %p866_p11 = scmp.ne.s32.totalorder %s1124_s23, %s865_s6  ;;  %p873_p1 = scmp.lt.s32.totalorder %s871_s10, %s865_s6 }
  0x1d   : > { %539 = vmatprep.subr.bf16.mxu1 %v826_v28 }
  0x1e   : > { %p867_p12 = pnand %p866_p11, %p1001_p5  ;;  %p874_p2 = por %p873_p1, %p872_p0 }
  0x1f   : > { %746 = vmatpush3.bf16.msra.mxu0 %v810_v9 }
  0x20   : > { %747 = vmatprep.subr.bf16.mxu0 %v811_v10  ;;  %540 = vmatpush1.bf16.msra.mxu1 %v828_v29  ;;  %p868_p13 = pneg %p867_p12 }
  0x21   : > { %541 = vmatprep.subr.bf16.mxu1 %v829_v30 }
  0x22   : > { %p875_p3 = pnand %p874_p2, %p868_p13 }
  0x23   : > { %748 = vmatpush3.bf16.msra.mxu0 %v812_v13 }
  0x24   : > { %749 = vmatprep.subr.bf16.mxu0 %v813_v15  ;;  %542 = vmatpush1.bf16.msra.mxu1 %v831_v31 }
  0x25   : > { %543 = vmatprep.subr.bf16.mxu1 %v832_v32 }
  0x27   : > { %750 = vmatpush3.bf16.msra.mxu0 %v814_v16 }
  0x28   : > { %751 = vmatprep.subr.bf16.mxu0 %v815_v17  ;;  %544 = vmatpush1.bf16.msra.mxu1 %v834_v33 }
  0x29   : > { %545 = vmatprep.subr.bf16.mxu1 %v835_v34 }
  0x2b   : > { %752 = vmatpush3.bf16.msra.mxu0 %v816_v18 }
  0x2c   : > { %546 = vmatpush1.bf16.msra.mxu1 %v837_v35 }
  0x2d   : > { %547 = vmatprep.subr.bf16.mxu1 %v838_v37 }
  0x2e   : > { %404 = vmatmul.mubr.bf16.vlgmr.msra.gmra.mrb[0].mxu0 %v234_v21 }
  0x30   : > { %548 = vmatpush1.bf16.msra.mxu1 %v840_v38 }
 0x101   : > { %v753_v39 = vpop.f32.mrb[0].mxu0 }
 0x102   : > { %v754_v41 = vpop.f32.mrb[1].mxu0 }
 0x103   : > { %v755_v42 = vadd.f32 %v754_v41, %v753_v39  ;;  %v756_v43 = vpop.f32.mrb[2].mxu0 }
 0x104   : > { %v757_v44 = vpop.f32.mrb[3].mxu0 }
 0x105   : > { %v406_v45 = vadd.f32 %v755_v42, %v689_v40  ;;  %v758_v46 = vadd.f32 %v757_v44, %v756_v43 }
 0x107   : > { %v706_v47 = vmul.f32 -1.442695, %v406_v45  ;;  %v409_v48 = vadd.f32 %v758_v46, %v689_v40 }
 0x109   : > { %841 = vpow2.f32 %v706_v47  ;;  %v707_v49 = vmul.f32 -1.442695, %v409_v48 }
 0x10b   : > { %843 = vpow2.f32 %v707_v49 }
 0x113   : > { %v842_v50 = vpop.eup %841 }
 0x114   : > { %v418_v51 = vadd.f32 1.0, %v842_v50 }
 0x115   : > { %v844_v52 = vpop.eup %843 }
 0x116   : > { %v419_v53 = vadd.f32 1.0, %v844_v52  ;;  %845 = vrcp.f32 %v418_v51 }
 0x118   : > { %847 = vrcp.f32 %v419_v53 }
 0x120   : > { %v846_v54 = vpop.eup %845 }
 0x122   : > { %v848_v55 = vpop.eup %847 }
 0x123   : > { %v424_v56 = vpack.c.bf16 %v848_v55, %v846_v54 }
 0x125   : > { %566 = vmatmul.mubr.bf16.vlgmr.msra.gmra.mrb[0].mxu1 %v424_v56 }
 0x1f8   : > { %v567_v0 = vpop.f32.mrb[0].mxu1 }
 0x1f9   : > { %v568_v1 = vadd.f32 %v567_v0, %v446_v62  ;;  %v569_v2 = vpop.f32.mrb[1].mxu1 }
 0x1fa   : > { %v570_v3 = vadd.f32 %v569_v2, %v450_v63  ;;  %v571_v4 = vpop.f32.mrb[2].mxu1 }
 0x1fb   : > { %v724_v5 = vmul.f32 -1.442695, %v568_v1  ;;  %v572_v6 = vadd.f32 %v571_v4, %v446_v62  ;;  %v573_v7 = vpop.f32.mrb[3].mxu1 }
 0x1fc   : > { %v725_v8 = vmul.f32 -1.442695, %v570_v3  ;;  %v574_v9 = vadd.f32 %v573_v7, %v450_v63 }
 0x1fd   : > { %849 = vpow2.f32 %v724_v5  ;;  %v726_v10 = vmul.f32 -1.442695, %v572_v6 }
 0x1fe   : > { %851 = vpow2.f32 %v725_v8  ;;  %v727_v11 = vmul.f32 -1.442695, %v574_v9 }
 0x1ff   : > { %853 = vpow2.f32 %v726_v10 }
 0x200   : > { %855 = vpow2.f32 %v727_v11 }
 0x207   : > { %v850_v12 = vpop.eup %849 }
 0x208   : > { %v852_v13 = vpop.eup %851  ;;  %v588_v14 = vadd.f32 1.0, %v850_v12 }
 0x209   : > { %v854_v15 = vpop.eup %853  ;;  %v589_v16 = vadd.f32 1.0, %v852_v13 }
 0x20a   : > { %v856_v17 = vpop.eup %855  ;;  %857 = vrcp.f32 %v588_v14  ;;  %v590_v18 = vadd.f32 1.0, %v854_v15 }
 0x20b   : > { %859 = vrcp.f32 %v589_v16  ;;  %v591_v19 = vadd.f32 1.0, %v856_v17 }
 0x20c   : > { %861 = vrcp.f32 %v590_v18 }
 0x20d   : > { %863 = vrcp.f32 %v591_v19 }
 0x214   : > { %v858_v20 = vpop.eup %857 }
 0x215   : > { %v860_v21 = vpop.eup %859  ;;  %600 = vst [vmem:[%s220_s12] sm:$0xff] %v858_v20 }
 0x216   : > { %v862_v22 = vpop.eup %861  ;;  %601 = vst [vmem:[%s220_s12 + $0x8] sm:$0xff] %v860_v21 }
 0x217   : > { %v864_v23 = vpop.eup %863  ;;  %602 = vst [vmem:[%s220_s12 + $0x10] sm:$0xff] %v862_v22 }
 0x218   : > { %603 = vst [vmem:[%s220_s12 + $0x18] sm:$0xff] %v864_v23 }
 0x219   : > { %878 = shalt.err (!%p875_p3)
}
 0x21a   : > { %s879_s11 = scalar_lea.hbm %s1122_s30, 512  ;;  %s883_s7 = scalar_lea.hbm %s1172_s5, 2048 }
 0x21b   : > { %p880_p4 = scmp.ne.s32.totalorder %s1122_s30, %s879_s11  ;;  %p884_p9 = scmp.lt.u32.totalorder %s1122_s30, %s1172_s5 }
 0x21c   : > { %p885_p10 = scmp.lt.u32.totalorder %s883_s7, %s879_s11  ;;  %p887_p12 = scmp.lt.u32.totalorder %s879_s11, %s1122_s30 }
 0x21d   : > { %p881_p7 = pnand %p880_p4, %p1001_p5 }
 0x21e   : > { %p886_p11 = por %p885_p10, %p884_p9 }
 0x21f   : > { %p882_p8 = pneg %p881_p7 }
 0x220   : > { %p888_p13 = por %p887_p12, %p886_p11 }
 0x222   : > { %p889_p0 = pnand %p888_p13, %p882_p8 }
 0x224   : > { %892 = shalt.err (!%p889_p0)
}
 0x225   : > { %s931_s17 = smov 256   ;;  %s932_s12 = smov 16  }
 0x226   : > { %759 = dma.vmem_to_hbm [thread:$0]  (%p1001_p5), %s1124_s23, 512, %s1122_s30, %s1126_s22, %s931_s17, %s931_s17, %s932_s12  }
 0x227 PF: > { %p765_p1 = scmp.ge.s32.totalorder %s927_s21, 2  ;;  %s634_s25 = sand.u32 1, %s915_s18  }
 0x228   : > { %s635_s26 = scalar_lea.sflag [#allocation3], %s634_s25 }
 0x229   : > { %p762_p2 = pnand %p765_p1, %p1005_p6 }
 0x22b   : > { %910 = dma.done.wait (!%p762_p2), %s635_s26, 512  }
 0x22c   : > { %912 = vsyncadd (!%p762_p2), %s635_s26, 4294966784  ;;  %p15_p3 = scmp.ge.s32.totalorder %s988_s24, 6   ;;  %s1175_s18 = smov %s919_s19 }
 0x22d   : > { %s1176_s19 = smov %s923_s20  ;;  %s1177_s20 = smov %s999_s27 }
 0x22e   : > { %s1178_s21 = smov %s988_s24  ;;  %17 = sbr.rel (!%p15_p3) target bundleno = 3 (0x3), region = 75 }
 0x235   :  { %640 = vsyncpa [#allocation3], 1 }
 0x236   :  { %642 = vsyncpa [#allocation3 + $0x1], 1 }

</bundles_post_ra>
